<compile_context>
chip_gen: v5e
topology: v5e:2x2
jax: 0.10.0
libtpu: 0.0.40
codegen_flags: <defaults>
</compile_context>

<pallas_src>
import functools

import jax
import jax.numpy as jnp
from jax.experimental import pallas as pl
from jax.experimental.pallas import tpu as pltpu

EPS = 1e-5
_LANE = 128
_TILE_CAP = 1024


# ------------------------------ tiling helpers ------------------------------ #

def _pad_and_tile(n, cap=_TILE_CAP):
    """Return (n_pad, tile): tile is a multiple of 128, n_pad a multiple of tile."""
    if n >= cap:
        tile = cap
    else:
        tile = ((n + _LANE - 1) // _LANE) * _LANE
    n_pad = ((n + tile - 1) // tile) * tile
    return n_pad, tile


def _pad_cols(a, n_pad):
    pad = n_pad - a.shape[1]
    return a if pad == 0 else jnp.pad(a, ((0, 0), (0, pad)))


# ----------------------------- Pallas kernels ------------------------------ #

def edge_pass1_kernel(catT_ref, w_ref, b_ref, wlw_ref, blw_ref,
                      msgT_ref, ewT_ref, sum_ref, sq_ref, *, n_valid, tile):
    """Per-tile edge message + GCN edge weight + masked BN statistics."""
    i = pl.program_id(0)

    @pl.when(i == 0)
    def _():
        sum_ref[...] = jnp.zeros_like(sum_ref)
        sq_ref[...] = jnp.zeros_like(sq_ref)

    # one fused MXU matmul: lin_ec(cat(lin_for_node(x_j - x_i), edge_attr, edge_f))
    msg = jnp.dot(w_ref[...], catT_ref[...],
                  preferred_element_type=jnp.float32) + b_ref[...]        # (Fe, TE)
    msgT_ref[...] = msg

    # GCN edge weight: relu(linw(msg)) as VPU multiply + sublane reduce (no width-1 matmul)
    ew = jnp.sum(msg * wlw_ref[...], axis=0, keepdims=True) + blw_ref[...]  # (1, TE)
    ewT_ref[...] = jnp.maximum(ew, 0.0)

    # masked sum / sum-of-squares accumulated across the ("arbitrary") grid axis
    lane = jax.lax.broadcasted_iota(jnp.int32, msg.shape, 1) + i * tile
    msg_m = jnp.where(lane < n_valid, msg, 0.0)
    sum_ref[...] += jnp.sum(msg_m, axis=1, keepdims=True)
    sq_ref[...] += jnp.sum(msg_m * msg_m, axis=1, keepdims=True)


def node_pass1_kernel(aggT_ref, w_ref, b_ref,
                      preT_ref, sum_ref, sq_ref, *, n_valid, tile):
    """GCN linear (on pre-aggregated features) + masked BN statistics."""
    i = pl.program_id(0)

    @pl.when(i == 0)
    def _():
        sum_ref[...] = jnp.zeros_like(sum_ref)
        sq_ref[...] = jnp.zeros_like(sq_ref)

    pre = jnp.dot(w_ref[...], aggT_ref[...],
                  preferred_element_type=jnp.float32) + b_ref[...]        # (Fn, TN)
    preT_ref[...] = pre

    lane = jax.lax.broadcasted_iota(jnp.int32, pre.shape, 1) + i * tile
    pre_m = jnp.where(lane < n_valid, pre, 0.0)
    sum_ref[...] += jnp.sum(pre_m, axis=1, keepdims=True)
    sq_ref[...] += jnp.sum(pre_m * pre_m, axis=1, keepdims=True)


def bn_relu_res_kernel(preT_ref, resT_ref, scale_ref, shift_ref, outT_ref):
    """Pass 2 (shared): BN affine + ReLU + residual, fully elementwise per tile."""
    outT_ref[...] = (jnp.maximum(preT_ref[...] * scale_ref[...] + shift_ref[...], 0.0)
                     + resT_ref[...])


# --------------------------- pallas_call wrappers --------------------------- #

def _run_edge_pass1(catT, w_comb, b_comb, wlw_col, blw, n_valid, n_pad, tile, f_out):
    d_in = catT.shape[0]
    return pl.pallas_call(
        functools.partial(edge_pass1_kernel, n_valid=n_valid, tile=tile),
        grid=(n_pad // tile,),
        in_specs=[
            pl.BlockSpec((d_in, tile), lambda i: (0, i)),
            pl.BlockSpec((f_out, d_in), lambda i: (0, 0)),
            pl.BlockSpec((f_out, 1), lambda i: (0, 0)),
            pl.BlockSpec((f_out, 1), lambda i: (0, 0)),
            pl.BlockSpec((1, 1), lambda i: (0, 0)),
        ],
        out_specs=(
            pl.BlockSpec((f_out, tile), lambda i: (0, i)),
            pl.BlockSpec((1, tile), lambda i: (0, i)),
            pl.BlockSpec((f_out, 1), lambda i: (0, 0)),
            pl.BlockSpec((f_out, 1), lambda i: (0, 0)),
        ),
        out_shape=(
            jax.ShapeDtypeStruct((f_out, n_pad), jnp.float32),
            jax.ShapeDtypeStruct((1, n_pad), jnp.float32),
            jax.ShapeDtypeStruct((f_out, 1), jnp.float32),
            jax.ShapeDtypeStruct((f_out, 1), jnp.float32),
        ),
        compiler_params=pltpu.CompilerParams(dimension_semantics=("arbitrary",)),
    )(catT, w_comb, b_comb, wlw_col, blw)


def _run_node_pass1(aggT, w_gcn, b_gcn, n_valid, n_pad, tile, f_out):
    d_in = aggT.shape[0]
    return pl.pallas_call(
        functools.partial(node_pass1_kernel, n_valid=n_valid, tile=tile),
        grid=(n_pad // tile,),
        in_specs=[
            pl.BlockSpec((d_in, tile), lambda i: (0, i)),
            pl.BlockSpec((f_out, d_in), lambda i: (0, 0)),
            pl.BlockSpec((f_out, 1), lambda i: (0, 0)),
        ],
        out_specs=(
            pl.BlockSpec((f_out, tile), lambda i: (0, i)),
            pl.BlockSpec((f_out, 1), lambda i: (0, 0)),
            pl.BlockSpec((f_out, 1), lambda i: (0, 0)),
        ),
        out_shape=(
            jax.ShapeDtypeStruct((f_out, n_pad), jnp.float32),
            jax.ShapeDtypeStruct((f_out, 1), jnp.float32),
            jax.ShapeDtypeStruct((f_out, 1), jnp.float32),
        ),
        compiler_params=pltpu.CompilerParams(dimension_semantics=("arbitrary",)),
    )(aggT, w_gcn, b_gcn)


def _run_pass2(preT, resT, scale, shift, n_pad, tile, f_out):
    return pl.pallas_call(
        bn_relu_res_kernel,
        grid=(n_pad // tile,),
        in_specs=[
            pl.BlockSpec((f_out, tile), lambda i: (0, i)),
            pl.BlockSpec((f_out, tile), lambda i: (0, i)),
            pl.BlockSpec((f_out, 1), lambda i: (0, 0)),
            pl.BlockSpec((f_out, 1), lambda i: (0, 0)),
        ],
        out_specs=pl.BlockSpec((f_out, tile), lambda i: (0, i)),
        out_shape=jax.ShapeDtypeStruct((f_out, n_pad), jnp.float32),
        compiler_params=pltpu.CompilerParams(dimension_semantics=("parallel",)),
    )(preT, resT, scale, shift)


# ------------------------------ JAX wrapper -------------------------------- #

def res_egblk_1_forward(params, x, edge_index, edge_f, edge_attr):
    N, node_in = x.shape
    E, edge_in = edge_attr.shape
    Ef = edge_f.shape[1]
    edge_out = params["W_ec"].shape[0]
    node_out = params["W_gcn"].shape[0]

    src = edge_index[0]     # x_j (source / neighbor)
    dst = edge_index[1]     # x_i (target)

    E_pad, TE = _pad_and_tile(E)
    N_pad, TN = _pad_and_tile(N)

    # ---- single lane-dense, transposed edge activation stream (gather = XLA glue) ----
    diff = x[src] - x[dst]                                               # (E, node_in)
    catT = _pad_cols(jnp.concatenate([diff, edge_attr, edge_f], axis=1).T, E_pad)
    eaT = _pad_cols(edge_attr.T, E_pad)                                  # residual stream

    # fold lin_for_node into lin_ec (one MXU matmul in the kernel)
    W_ec = params["W_ec"]
    W_ec_n = W_ec[:, :node_in]
    W_ec_e = W_ec[:, node_in:node_in + edge_in]
    W_ec_f = W_ec[:, node_in + edge_in:]
    W_comb = jnp.concatenate([W_ec_n @ params["W_node"], W_ec_e, W_ec_f], axis=1)
    b_comb = (W_ec_n @ params["b_node"] + params["b_ec"]).reshape(-1, 1)
    wlw_col = params["W_lw"].T                                           # (edge_out, 1)
    blw = params["b_lw"].reshape(1, 1)

    msgT, ewT, esum, esq = _run_edge_pass1(
        catT, W_comb, b_comb, wlw_col, blw, E, E_pad, TE, edge_out)

    # per-feature BN affine (training-mode batch stats, biased variance) — tiny, per-feature
    mean_e = esum / E
    var_e = jnp.maximum(esq / E - mean_e * mean_e, 0.0)
    scale_e = params["gamma_e"].reshape(-1, 1) * jax.lax.rsqrt(var_e + EPS)
    shift_e = params["beta_e"].reshape(-1, 1) - mean_e * scale_e

    efeatT = _run_pass2(msgT, eaT, scale_e, shift_e, E_pad, TE, edge_out)
    edge_features = efeatT[:, :E].T                                      # (E, edge_out)

    # ---- GCN sparse aggregation (data-dependent gather/scatter: XLA segment_sum) ----
    ew = ewT[0, :E]
    deg = jax.ops.segment_sum(ew, dst, num_segments=N)
    dinv = jnp.where(deg > 0, jax.lax.rsqrt(jnp.maximum(deg, 1e-30)), 0.0)
    norm = dinv[src] * ew * dinv[dst]
    agg = jax.ops.segment_sum(norm[:, None] * x[src], dst, num_segments=N)  # (N, node_in)

    aggT = _pad_cols(agg.T, N_pad)
    xT = _pad_cols(x.T, N_pad)                                           # node residual

    preT, nsum, nsq = _run_node_pass1(
        aggT, params["W_gcn"], params["b_gcn"].reshape(-1, 1), N, N_pad, TN, node_out)

    mean_n = nsum / N
    var_n = jnp.maximum(nsq / N - mean_n * mean_n, 0.0)
    scale_n = params["gamma_n"].reshape(-1, 1) * jax.lax.rsqrt(var_n + EPS)
    shift_n = params["beta_n"].reshape(-1, 1) - mean_n * scale_n

    xoutT = _run_pass2(preT, xT, scale_n, shift_n, N_pad, TN, node_out)
    x_out = xoutT[:, :N].T                                               # (N, node_out)

    return x_out, edge_index, edge_f, edge_features


# ------------------------------- parameters -------------------------------- #

def init_params(key, node_in, node_out, edge_in, edge_out, Ef):
    ks = jax.random.split(key, 10)

    def lin(k, out_f, in_f):
        bound = 1.0 / jnp.sqrt(in_f)
        kw, kb = jax.random.split(k)
        W = jax.random.uniform(kw, (out_f, in_f), jnp.float32, -bound, bound)
        b = jax.random.uniform(kb, (out_f,), jnp.float32, -bound, bound)
        return W, b

    W_node, b_node = lin(ks[0], node_in, node_in)                       # lin_for_node
    W_ec, b_ec = lin(ks[1], edge_out, node_in + edge_in + Ef)           # lin_ec
    W_lw, b_lw = lin(ks[2], 1, edge_out)                                # linw (edge weight)
    W_gcn, b_gcn = lin(ks[3], node_out, node_in)                        # GCN linear + bias

    gamma_e = 1.0 + 0.1 * jax.random.normal(ks[4], (edge_out,), jnp.float32)
    beta_e = 0.1 * jax.random.normal(ks[5], (edge_out,), jnp.float32)
    gamma_n = 1.0 + 0.1 * jax.random.normal(ks[6], (node_out,), jnp.float32)
    beta_n = 0.1 * jax.random.normal(ks[7], (node_out,), jnp.float32)

    return dict(W_node=W_node, b_node=b_node, W_ec=W_ec, b_ec=b_ec,
                W_lw=W_lw, b_lw=b_lw, W_gcn=W_gcn, b_gcn=b_gcn,
                gamma_e=gamma_e, beta_e=beta_e, gamma_n=gamma_n, beta_n=beta_n)


# ---------------------------------- main ------------------------------------ #

if __name__ == "__main__":
    N, E = 16, 32
    node_in = node_out = 8      # use_nodelin=False -> residual requires node_in == node_out
    edge_in = edge_out = 8      # use_edgelin=False -> residual requires edge_in == edge_out
    Ef = 4

    key = jax.random.PRNGKey(0)
    k_x, k_ea, k_ef, k_ei, k_p = jax.random.split(key, 5)

    x = jax.random.normal(k_x, (N, node_in), jnp.float32)
    edge_attr = jax.random.normal(k_ea, (E, edge_in), jnp.float32)
    edge_f = jax.random.normal(k_ef, (E, Ef), jnp.float32)
    edge_index = jax.random.randint(k_ei, (2, E), 0, N, jnp.int32)

    params = init_params(k_p, node_in, node_out, edge_in, edge_out, Ef)

    fwd = jax.jit(res_egblk_1_forward)
    x_out, ei_out, ef_out, e_feat_out = fwd(params, x, edge_index, edge_f, edge_attr)
    jax.block_until_ready((x_out, e_feat_out))

    assert x_out.shape == (N, node_out)
    assert e_feat_out.shape == (E, edge_out)
    assert bool(jnp.all(jnp.isfinite(x_out))) and bool(jnp.all(jnp.isfinite(e_feat_out)))
    print("KERNEL_OK")
</pallas_src>

<mosaic_0001>
module attributes {stable_mosaic.version = 11 : i64} {
  func.func @edge_pass1_kernel(%arg0: i32, %arg1: memref<20x128xf32, #tpu.memory_space<vmem>>, %arg2: memref<8x20xf32, #tpu.memory_space<vmem>>, %arg3: memref<8x1xf32, #tpu.memory_space<vmem>>, %arg4: memref<8x1xf32, #tpu.memory_space<vmem>>, %arg5: memref<1x1xf32, #tpu.memory_space<vmem>>, %arg6: memref<8x128xf32, #tpu.memory_space<vmem>>, %arg7: memref<1x128xf32, #tpu.memory_space<vmem>>, %arg8: memref<8x1xf32, #tpu.memory_space<vmem>>, %arg9: memref<8x1xf32, #tpu.memory_space<vmem>>) attributes {dimension_semantics = [#tpu.dimension_semantics<arbitrary>], iteration_bounds = array<i64: 1>, scalar_prefetch = 0 : i64, scratch_operands = 0 : i64, tpu.core_type = #tpu.core_type<tc>, window_params = [{transform_indices = @transform_0, window_bounds = array<i64: 20, 128>}, {pipeline_mode = #tpu.pipeline_mode<synchronous>, transform_indices = @transform_1, window_bounds = array<i64: 8, 20>}, {pipeline_mode = #tpu.pipeline_mode<synchronous>, transform_indices = @transform_2, window_bounds = array<i64: 8, 1>}, {pipeline_mode = #tpu.pipeline_mode<synchronous>, transform_indices = @transform_3, window_bounds = array<i64: 8, 1>}, {pipeline_mode = #tpu.pipeline_mode<synchronous>, transform_indices = @transform_4, window_bounds = array<i64: 1, 1>}, {transform_indices = @transform_5, window_bounds = array<i64: 8, 128>}, {transform_indices = @transform_6, window_bounds = array<i64: 1, 128>}, {pipeline_mode = #tpu.pipeline_mode<synchronous>, transform_indices = @transform_7, window_bounds = array<i64: 8, 1>}, {pipeline_mode = #tpu.pipeline_mode<synchronous>, transform_indices = @transform_8, window_bounds = array<i64: 8, 1>}]} {
    %c0_i32 = arith.constant 0 : i32
    %0 = arith.cmpi eq, %arg0, %c0_i32 : i32
    %1 = arith.extui %0 : i1 to i32
    %c0_i32_0 = arith.constant 0 : i32
    %2 = arith.cmpi ne, %1, %c0_i32_0 : i32
    scf.if %2 {
      %cst_27 = arith.constant 0.000000e+00 : f32
      %40 = vector.broadcast %cst_27 : f32 to vector<8x1xf32>
      %c0_28 = arith.constant 0 : index
      %c0_29 = arith.constant 0 : index
      %41 = vector.load %arg8[%c0_28, %c0_29] : memref<8x1xf32, #tpu.memory_space<vmem>>, vector<8x1xf32>
      tpu.vector_store %arg8[%c0_28, %c0_29], %40 {strides = array<i32>} : memref<8x1xf32, #tpu.memory_space<vmem>>, vector<8x1xf32>,
      %cst_30 = arith.constant 0.000000e+00 : f32
      %42 = vector.broadcast %cst_30 : f32 to vector<8x1xf32>
      %c0_31 = arith.constant 0 : index
      %c0_32 = arith.constant 0 : index
      %43 = vector.load %arg9[%c0_31, %c0_32] : memref<8x1xf32, #tpu.memory_space<vmem>>, vector<8x1xf32>
      tpu.vector_store %arg9[%c0_31, %c0_32], %42 {strides = array<i32>} : memref<8x1xf32, #tpu.memory_space<vmem>>, vector<8x1xf32>,
    } else {
    }
    %c0 = arith.constant 0 : index
    %c0_1 = arith.constant 0 : index
    %3 = vector.load %arg2[%c0, %c0_1] : memref<8x20xf32, #tpu.memory_space<vmem>>, vector<8x20xf32>
    %c0_2 = arith.constant 0 : index
    %c0_3 = arith.constant 0 : index
    %4 = vector.load %arg1[%c0_2, %c0_3] : memref<20x128xf32, #tpu.memory_space<vmem>>, vector<20x128xf32>
    %cst = arith.constant dense<0.000000e+00> : vector<8x128xf32>
    %5 = tpu.matmul %3, %4, %cst {dimension_numbers = #tpu.dot_dimension_numbers<[1], [0], [0], [1], [0, 0, 1, 1], [], []>} : vector<8x20xf32>, vector<20x128xf32>, vector<8x128xf32> -> vector<8x128xf32>
    %c0_4 = arith.constant 0 : index
    %c0_5 = arith.constant 0 : index
    %6 = vector.load %arg3[%c0_4, %c0_5] : memref<8x1xf32, #tpu.memory_space<vmem>>, vector<8x1xf32>
    %7 = vector.broadcast %6 : vector<8x1xf32> to vector<8x128xf32>
    %8 = arith.addf %5, %7 : vector<8x128xf32>
    %c0_6 = arith.constant 0 : index
    %c0_7 = arith.constant 0 : index
    %9 = vector.load %arg6[%c0_6, %c0_7] : memref<8x128xf32, #tpu.memory_space<vmem>>, vector<8x128xf32>
    tpu.vector_store %arg6[%c0_6, %c0_7], %8 {strides = array<i32>} : memref<8x128xf32, #tpu.memory_space<vmem>>, vector<8x128xf32>,
    %c0_8 = arith.constant 0 : index
    %c0_9 = arith.constant 0 : index
    %10 = vector.load %arg4[%c0_8, %c0_9] : memref<8x1xf32, #tpu.memory_space<vmem>>, vector<8x1xf32>
    %11 = vector.broadcast %10 : vector<8x1xf32> to vector<8x128xf32>
    %12 = arith.mulf %8, %11 : vector<8x128xf32>
    %cst_10 = arith.constant dense<0.000000e+00> : vector<128xf32>
    %13 = vector.multi_reduction <add>, %12, %cst_10 [0] : vector<8x128xf32> to vector<128xf32>
    %14 = vector.shape_cast %13 : vector<128xf32> to vector<1x128xf32>
    %c0_11 = arith.constant 0 : index
    %c0_12 = arith.constant 0 : index
    %15 = vector.load %arg5[%c0_11, %c0_12] : memref<1x1xf32, #tpu.memory_space<vmem>>, vector<1x1xf32>
    %16 = vector.broadcast %15 : vector<1x1xf32> to vector<1x128xf32>
    %17 = arith.addf %14, %16 : vector<1x128xf32>
    %cst_13 = arith.constant 0.000000e+00 : f32
    %18 = vector.broadcast %cst_13 : f32 to vector<1x128xf32>
    %19 = arith.maximumf %17, %18 : vector<1x128xf32>
    %c0_14 = arith.constant 0 : index
    %c0_15 = arith.constant 0 : index
    %20 = vector.load %arg7[%c0_14, %c0_15] : memref<1x128xf32, #tpu.memory_space<vmem>>, vector<1x128xf32>
    tpu.vector_store %arg7[%c0_14, %c0_15], %19 {strides = array<i32>} : memref<1x128xf32, #tpu.memory_space<vmem>>, vector<1x128xf32>,
    %21 = tpu.iota {dimensions = array<i32: 1>} : vector<8x128xi32>
    %c128_i32 = arith.constant 128 : i32
    %22 = arith.muli %arg0, %c128_i32 : i32
    %23 = vector.broadcast %22 : i32 to vector<8x128xi32>
    %24 = arith.addi %21, %23 : vector<8x128xi32>
    %c32_i32 = arith.constant 32 : i32
    %25 = vector.broadcast %c32_i32 : i32 to vector<8x128xi32>
    %26 = arith.cmpi slt, %24, %25 : vector<8x128xi32>
    %cst_16 = arith.constant 0.000000e+00 : f32
    %27 = vector.broadcast %cst_16 : f32 to vector<8x128xf32>
    %28 = arith.select %26, %8, %27 : vector<8x128xi1>, vector<8x128xf32>
    %c0_17 = arith.constant 0 : index
    %c0_18 = arith.constant 0 : index
    %29 = vector.load %arg8[%c0_17, %c0_18] : memref<8x1xf32, #tpu.memory_space<vmem>>, vector<8x1xf32>
    %cst_19 = arith.constant dense<0.000000e+00> : vector<8xf32>
    %30 = vector.multi_reduction <add>, %28, %cst_19 [1] : vector<8x128xf32> to vector<8xf32>
    %31 = vector.shape_cast %30 : vector<8xf32> to vector<8x1xf32>
    %32 = arith.addf %29, %31 : vector<8x1xf32>
    %c0_20 = arith.constant 0 : index
    %c0_21 = arith.constant 0 : index
    %33 = vector.load %arg8[%c0_20, %c0_21] : memref<8x1xf32, #tpu.memory_space<vmem>>, vector<8x1xf32>
    tpu.vector_store %arg8[%c0_20, %c0_21], %32 {strides = array<i32>} : memref<8x1xf32, #tpu.memory_space<vmem>>, vector<8x1xf32>,
    %c0_22 = arith.constant 0 : index
    %c0_23 = arith.constant 0 : index
    %34 = vector.load %arg9[%c0_22, %c0_23] : memref<8x1xf32, #tpu.memory_space<vmem>>, vector<8x1xf32>
    %35 = arith.mulf %28, %28 : vector<8x128xf32>
    %cst_24 = arith.constant dense<0.000000e+00> : vector<8xf32>
    %36 = vector.multi_reduction <add>, %35, %cst_24 [1] : vector<8x128xf32> to vector<8xf32>
    %37 = vector.shape_cast %36 : vector<8xf32> to vector<8x1xf32>
    %38 = arith.addf %34, %37 : vector<8x1xf32>
    %c0_25 = arith.constant 0 : index
    %c0_26 = arith.constant 0 : index
    %39 = vector.load %arg9[%c0_25, %c0_26] : memref<8x1xf32, #tpu.memory_space<vmem>>, vector<8x1xf32>
    tpu.vector_store %arg9[%c0_25, %c0_26], %38 {strides = array<i32>} : memref<8x1xf32, #tpu.memory_space<vmem>>, vector<8x1xf32>,
    return
  }
  func.func @transform_0(%arg0: i32) -> (i32, i32) {
    %c0_i32 = arith.constant 0 : i32
    %c0_i32_0 = arith.constant 0 : i32
    return %c0_i32, %arg0 : i32, i32
  }
  func.func @transform_1(%arg0: i32) -> (i32, i32) {
    %c0_i32 = arith.constant 0 : i32
    %c0_i32_0 = arith.constant 0 : i32
    %c0_i32_1 = arith.constant 0 : i32
    return %c0_i32, %c0_i32_0 : i32, i32
  }
  func.func @transform_2(%arg0: i32) -> (i32, i32) {
    %c0_i32 = arith.constant 0 : i32
    %c0_i32_0 = arith.constant 0 : i32
    %c0_i32_1 = arith.constant 0 : i32
    return %c0_i32, %c0_i32_0 : i32, i32
  }
  func.func @transform_3(%arg0: i32) -> (i32, i32) {
    %c0_i32 = arith.constant 0 : i32
    %c0_i32_0 = arith.constant 0 : i32
    %c0_i32_1 = arith.constant 0 : i32
    return %c0_i32, %c0_i32_0 : i32, i32
  }
  func.func @transform_4(%arg0: i32) -> (i32, i32) {
    %c0_i32 = arith.constant 0 : i32
    %c0_i32_0 = arith.constant 0 : i32
    %c0_i32_1 = arith.constant 0 : i32
    return %c0_i32, %c0_i32_0 : i32, i32
  }
  func.func @transform_5(%arg0: i32) -> (i32, i32) {
    %c0_i32 = arith.constant 0 : i32
    %c0_i32_0 = arith.constant 0 : i32
    return %c0_i32, %arg0 : i32, i32
  }
  func.func @transform_6(%arg0: i32) -> (i32, i32) {
    %c0_i32 = arith.constant 0 : i32
    %c0_i32_0 = arith.constant 0 : i32
    return %c0_i32, %arg0 : i32, i32
  }
  func.func @transform_7(%arg0: i32) -> (i32, i32) {
    %c0_i32 = arith.constant 0 : i32
    %c0_i32_0 = arith.constant 0 : i32
    %c0_i32_1 = arith.constant 0 : i32
    return %c0_i32, %c0_i32_0 : i32, i32
  }
  func.func @transform_8(%arg0: i32) -> (i32, i32) {
    %c0_i32 = arith.constant 0 : i32
    %c0_i32_0 = arith.constant 0 : i32
    %c0_i32_1 = arith.constant 0 : i32
    return %c0_i32, %c0_i32_0 : i32, i32
  }
}

module attributes {stable_mosaic.version = 11 : i64} {
  func.func @node_pass1_kernel(%arg0: i32, %arg1: memref<8x128xf32, #tpu.memory_space<vmem>>, %arg2: memref<8x8xf32, #tpu.memory_space<vmem>>, %arg3: memref<8x1xf32, #tpu.memory_space<vmem>>, %arg4: memref<8x128xf32, #tpu.memory_space<vmem>>, %arg5: memref<8x1xf32, #tpu.memory_space<vmem>>, %arg6: memref<8x1xf32, #tpu.memory_space<vmem>>) attributes {dimension_semantics = [#tpu.dimension_semantics<arbitrary>], iteration_bounds = array<i64: 1>, scalar_prefetch = 0 : i64, scratch_operands = 0 : i64, tpu.core_type = #tpu.core_type<tc>, window_params = [{transform_indices = @transform_0, window_bounds = array<i64: 8, 128>}, {pipeline_mode = #tpu.pipeline_mode<synchronous>, transform_indices = @transform_1, window_bounds = array<i64: 8, 8>}, {pipeline_mode = #tpu.pipeline_mode<synchronous>, transform_indices = @transform_2, window_bounds = array<i64: 8, 1>}, {transform_indices = @transform_3, window_bounds = array<i64: 8, 128>}, {pipeline_mode = #tpu.pipeline_mode<synchronous>, transform_indices = @transform_4, window_bounds = array<i64: 8, 1>}, {pipeline_mode = #tpu.pipeline_mode<synchronous>, transform_indices = @transform_5, window_bounds = array<i64: 8, 1>}]} {
    %c0_i32 = arith.constant 0 : i32
    %0 = arith.cmpi eq, %arg0, %c0_i32 : i32
    %1 = arith.extui %0 : i1 to i32
    %c0_i32_0 = arith.constant 0 : i32
    %2 = arith.cmpi ne, %1, %c0_i32_0 : i32
    scf.if %2 {
      %cst_19 = arith.constant 0.000000e+00 : f32
      %29 = vector.broadcast %cst_19 : f32 to vector<8x1xf32>
      %c0_20 = arith.constant 0 : index
      %c0_21 = arith.constant 0 : index
      %30 = vector.load %arg5[%c0_20, %c0_21] : memref<8x1xf32, #tpu.memory_space<vmem>>, vector<8x1xf32>
      tpu.vector_store %arg5[%c0_20, %c0_21], %29 {strides = array<i32>} : memref<8x1xf32, #tpu.memory_space<vmem>>, vector<8x1xf32>,
      %cst_22 = arith.constant 0.000000e+00 : f32
      %31 = vector.broadcast %cst_22 : f32 to vector<8x1xf32>
      %c0_23 = arith.constant 0 : index
      %c0_24 = arith.constant 0 : index
      %32 = vector.load %arg6[%c0_23, %c0_24] : memref<8x1xf32, #tpu.memory_space<vmem>>, vector<8x1xf32>
      tpu.vector_store %arg6[%c0_23, %c0_24], %31 {strides = array<i32>} : memref<8x1xf32, #tpu.memory_space<vmem>>, vector<8x1xf32>,
    } else {
    }
    %c0 = arith.constant 0 : index
    %c0_1 = arith.constant 0 : index
    %3 = vector.load %arg2[%c0, %c0_1] : memref<8x8xf32, #tpu.memory_space<vmem>>, vector<8x8xf32>
    %c0_2 = arith.constant 0 : index
    %c0_3 = arith.constant 0 : index
    %4 = vector.load %arg1[%c0_2, %c0_3] : memref<8x128xf32, #tpu.memory_space<vmem>>, vector<8x128xf32>
    %cst = arith.constant dense<0.000000e+00> : vector<8x128xf32>
    %5 = tpu.matmul %3, %4, %cst {dimension_numbers = #tpu.dot_dimension_numbers<[1], [0], [0], [1], [0, 0, 1, 1], [], []>} : vector<8x8xf32>, vector<8x128xf32>, vector<8x128xf32> -> vector<8x128xf32>
    %c0_4 = arith.constant 0 : index
    %c0_5 = arith.constant 0 : index
    %6 = vector.load %arg3[%c0_4, %c0_5] : memref<8x1xf32, #tpu.memory_space<vmem>>, vector<8x1xf32>
    %7 = vector.broadcast %6 : vector<8x1xf32> to vector<8x128xf32>
    %8 = arith.addf %5, %7 : vector<8x128xf32>
    %c0_6 = arith.constant 0 : index
    %c0_7 = arith.constant 0 : index
    %9 = vector.load %arg4[%c0_6, %c0_7] : memref<8x128xf32, #tpu.memory_space<vmem>>, vector<8x128xf32>
    tpu.vector_store %arg4[%c0_6, %c0_7], %8 {strides = array<i32>} : memref<8x128xf32, #tpu.memory_space<vmem>>, vector<8x128xf32>,
    %10 = tpu.iota {dimensions = array<i32: 1>} : vector<8x128xi32>
    %c128_i32 = arith.constant 128 : i32
    %11 = arith.muli %arg0, %c128_i32 : i32
    %12 = vector.broadcast %11 : i32 to vector<8x128xi32>
    %13 = arith.addi %10, %12 : vector<8x128xi32>
    %c16_i32 = arith.constant 16 : i32
    %14 = vector.broadcast %c16_i32 : i32 to vector<8x128xi32>
    %15 = arith.cmpi slt, %13, %14 : vector<8x128xi32>
    %cst_8 = arith.constant 0.000000e+00 : f32
    %16 = vector.broadcast %cst_8 : f32 to vector<8x128xf32>
    %17 = arith.select %15, %8, %16 : vector<8x128xi1>, vector<8x128xf32>
    %c0_9 = arith.constant 0 : index
    %c0_10 = arith.constant 0 : index
    %18 = vector.load %arg5[%c0_9, %c0_10] : memref<8x1xf32, #tpu.memory_space<vmem>>, vector<8x1xf32>
    %cst_11 = arith.constant dense<0.000000e+00> : vector<8xf32>
    %19 = vector.multi_reduction <add>, %17, %cst_11 [1] : vector<8x128xf32> to vector<8xf32>
    %20 = vector.shape_cast %19 : vector<8xf32> to vector<8x1xf32>
    %21 = arith.addf %18, %20 : vector<8x1xf32>
    %c0_12 = arith.constant 0 : index
    %c0_13 = arith.constant 0 : index
    %22 = vector.load %arg5[%c0_12, %c0_13] : memref<8x1xf32, #tpu.memory_space<vmem>>, vector<8x1xf32>
    tpu.vector_store %arg5[%c0_12, %c0_13], %21 {strides = array<i32>} : memref<8x1xf32, #tpu.memory_space<vmem>>, vector<8x1xf32>,
    %c0_14 = arith.constant 0 : index
    %c0_15 = arith.constant 0 : index
    %23 = vector.load %arg6[%c0_14, %c0_15] : memref<8x1xf32, #tpu.memory_space<vmem>>, vector<8x1xf32>
    %24 = arith.mulf %17, %17 : vector<8x128xf32>
    %cst_16 = arith.constant dense<0.000000e+00> : vector<8xf32>
    %25 = vector.multi_reduction <add>, %24, %cst_16 [1] : vector<8x128xf32> to vector<8xf32>
    %26 = vector.shape_cast %25 : vector<8xf32> to vector<8x1xf32>
    %27 = arith.addf %23, %26 : vector<8x1xf32>
    %c0_17 = arith.constant 0 : index
    %c0_18 = arith.constant 0 : index
    %28 = vector.load %arg6[%c0_17, %c0_18] : memref<8x1xf32, #tpu.memory_space<vmem>>, vector<8x1xf32>
    tpu.vector_store %arg6[%c0_17, %c0_18], %27 {strides = array<i32>} : memref<8x1xf32, #tpu.memory_space<vmem>>, vector<8x1xf32>,
    return
  }
  func.func @transform_0(%arg0: i32) -> (i32, i32) {
    %c0_i32 = arith.constant 0 : i32
    %c0_i32_0 = arith.constant 0 : i32
    return %c0_i32, %arg0 : i32, i32
  }
  func.func @transform_1(%arg0: i32) -> (i32, i32) {
    %c0_i32 = arith.constant 0 : i32
    %c0_i32_0 = arith.constant 0 : i32
    %c0_i32_1 = arith.constant 0 : i32
    return %c0_i32, %c0_i32_0 : i32, i32
  }
  func.func @transform_2(%arg0: i32) -> (i32, i32) {
    %c0_i32 = arith.constant 0 : i32
    %c0_i32_0 = arith.constant 0 : i32
    %c0_i32_1 = arith.constant 0 : i32
    return %c0_i32, %c0_i32_0 : i32, i32
  }
  func.func @transform_3(%arg0: i32) -> (i32, i32) {
    %c0_i32 = arith.constant 0 : i32
    %c0_i32_0 = arith.constant 0 : i32
    return %c0_i32, %arg0 : i32, i32
  }
  func.func @transform_4(%arg0: i32) -> (i32, i32) {
    %c0_i32 = arith.constant 0 : i32
    %c0_i32_0 = arith.constant 0 : i32
    %c0_i32_1 = arith.constant 0 : i32
    return %c0_i32, %c0_i32_0 : i32, i32
  }
  func.func @transform_5(%arg0: i32) -> (i32, i32) {
    %c0_i32 = arith.constant 0 : i32
    %c0_i32_0 = arith.constant 0 : i32
    %c0_i32_1 = arith.constant 0 : i32
    return %c0_i32, %c0_i32_0 : i32, i32
  }
}

module attributes {stable_mosaic.version = 11 : i64} {
  func.func @bn_relu_res_kernel(%arg0: i32, %arg1: memref<8x128xf32, #tpu.memory_space<vmem>>, %arg2: memref<8x128xf32, #tpu.memory_space<vmem>>, %arg3: memref<8x1xf32, #tpu.memory_space<vmem>>, %arg4: memref<8x1xf32, #tpu.memory_space<vmem>>, %arg5: memref<8x128xf32, #tpu.memory_space<vmem>>) attributes {dimension_semantics = [#tpu.dimension_semantics<parallel>], iteration_bounds = array<i64: 1>, scalar_prefetch = 0 : i64, scratch_operands = 0 : i64, tpu.core_type = #tpu.core_type<tc>, window_params = [{transform_indices = @transform_0, window_bounds = array<i64: 8, 128>}, {transform_indices = @transform_1, window_bounds = array<i64: 8, 128>}, {pipeline_mode = #tpu.pipeline_mode<synchronous>, transform_indices = @transform_2, window_bounds = array<i64: 8, 1>}, {pipeline_mode = #tpu.pipeline_mode<synchronous>, transform_indices = @transform_3, window_bounds = array<i64: 8, 1>}, {transform_indices = @transform_4, window_bounds = array<i64: 8, 128>}]} {
    %c0 = arith.constant 0 : index
    %c0_0 = arith.constant 0 : index
    %0 = vector.load %arg1[%c0, %c0_0] : memref<8x128xf32, #tpu.memory_space<vmem>>, vector<8x128xf32>
    %c0_1 = arith.constant 0 : index
    %c0_2 = arith.constant 0 : index
    %1 = vector.load %arg3[%c0_1, %c0_2] : memref<8x1xf32, #tpu.memory_space<vmem>>, vector<8x1xf32>
    %2 = vector.broadcast %1 : vector<8x1xf32> to vector<8x128xf32>
    %3 = arith.mulf %0, %2 : vector<8x128xf32>
    %c0_3 = arith.constant 0 : index
    %c0_4 = arith.constant 0 : index
    %4 = vector.load %arg4[%c0_3, %c0_4] : memref<8x1xf32, #tpu.memory_space<vmem>>, vector<8x1xf32>
    %5 = vector.broadcast %4 : vector<8x1xf32> to vector<8x128xf32>
    %6 = arith.addf %3, %5 : vector<8x128xf32>
    %cst = arith.constant 0.000000e+00 : f32
    %7 = vector.broadcast %cst : f32 to vector<8x128xf32>
    %8 = arith.maximumf %6, %7 : vector<8x128xf32>
    %c0_5 = arith.constant 0 : index
    %c0_6 = arith.constant 0 : index
    %9 = vector.load %arg2[%c0_5, %c0_6] : memref<8x128xf32, #tpu.memory_space<vmem>>, vector<8x128xf32>
    %10 = arith.addf %8, %9 : vector<8x128xf32>
    %c0_7 = arith.constant 0 : index
    %c0_8 = arith.constant 0 : index
    %11 = vector.load %arg5[%c0_7, %c0_8] : memref<8x128xf32, #tpu.memory_space<vmem>>, vector<8x128xf32>
    tpu.vector_store %arg5[%c0_7, %c0_8], %10 {strides = array<i32>} : memref<8x128xf32, #tpu.memory_space<vmem>>, vector<8x128xf32>,
    return
  }
  func.func @transform_0(%arg0: i32) -> (i32, i32) {
    %c0_i32 = arith.constant 0 : i32
    %c0_i32_0 = arith.constant 0 : i32
    return %c0_i32, %arg0 : i32, i32
  }
  func.func @transform_1(%arg0: i32) -> (i32, i32) {
    %c0_i32 = arith.constant 0 : i32
    %c0_i32_0 = arith.constant 0 : i32
    return %c0_i32, %arg0 : i32, i32
  }
  func.func @transform_2(%arg0: i32) -> (i32, i32) {
    %c0_i32 = arith.constant 0 : i32
    %c0_i32_0 = arith.constant 0 : i32
    %c0_i32_1 = arith.constant 0 : i32
    return %c0_i32, %c0_i32_0 : i32, i32
  }
  func.func @transform_3(%arg0: i32) -> (i32, i32) {
    %c0_i32 = arith.constant 0 : i32
    %c0_i32_0 = arith.constant 0 : i32
    %c0_i32_1 = arith.constant 0 : i32
    return %c0_i32, %c0_i32_0 : i32, i32
  }
  func.func @transform_4(%arg0: i32) -> (i32, i32) {
    %c0_i32 = arith.constant 0 : i32
    %c0_i32_0 = arith.constant 0 : i32
    return %c0_i32, %arg0 : i32, i32
  }
}

</mosaic_0001>

<bundles_post_ra>
// kernel: sub.5
= control target key start
LH: loop header
LB: loop body
LE: loop exit
PB: predicated region body
PF: predicated region fallthrough
CT: control target
= control target key end

     0   :  { %s34_s0 = inlined_call_operand.vmem [shape: f32[32,8], index: 0, kind: input, shape index: {}]   ;;  %s35_s1 = inlined_call_operand.vmem [shape: f32[32,8], index: 1, kind: input, shape index: {}]   ;;  %s36_s2 = inlined_call_operand.vmem [shape: f32[32,8], index: 2, kind: output, shape index: {}]  }
   0x1   :  { %v3_v0 = vld [vmem:[%s34_s0] sm:$0xff] }
   0x2   :  { %v4_v1 = vld [vmem:[%s35_s1] sm:$0xff] }
   0x3   :  { %v7_v2 = vsub.f32 %v3_v0, %v4_v1 }
   0x5   :  { %9 = vst [vmem:[%s36_s2] sm:$0xff] %v7_v2 }

// kernel: res_egblk_1_forward.4
= control target key start
LH: loop header
LB: loop body
LE: loop exit
PB: predicated region body
PF: predicated region fallthrough
CT: control target
= control target key end

     0   :  { %vm47_vm0 = vcmask 1043456   ;;  %v136_v2 = vmov 0   ;;  %vm43_vm1 = vcmask 162816   ;;  %vm30_vm2 = vcmask 7168   ;;  %s232_s0 = inlined_call_operand.vmem [shape: f32[20,128], index: 0, kind: input, shape index: {}]   ;;  %s233_s2 = inlined_call_operand.vmem [shape: f32[8,1], index: 2, kind: input, shape index: {}]   ;;  %s234_s4 = inlined_call_operand.<no memory space> [shape: f32[1,1], index: 4, kind: input, shape index: {}]   ;;  %s235_s1 = inlined_call_operand.vmem [shape: f32[8,20], index: 1, kind: input, shape index: {}]   ;;  %s236_s3 = inlined_call_operand.vmem [shape: f32[8,1], index: 3, kind: input, shape index: {}]   ;;  %s237_s7 = inlined_call_operand.vmem [shape: f32[8,1], index: 7, kind: output, shape index: {2}]   ;;  %s238_s8 = inlined_call_operand.vmem [shape: f32[8,1], index: 8, kind: output, shape index: {3}]   ;;  %s239_s5 = inlined_call_operand.vmem [shape: f32[8,128], index: 5, kind: output, shape index: {0}]   ;;  %s240_s6 = inlined_call_operand.vmem [shape: f32[1,128], index: 6, kind: output, shape index: {1}]  }
   0x1   :  { %v36_v0 = vld [vmem:[%s232_s0 + $0x10] sm:$0xf]  ;;  %v35_v1 = vld [vmem:[%s232_s0 + $0x8] sm:$0xff]  ;;  %134 = vset.pattern.permute.xlu0 %v136_v2  ;;  %135 = vset.pattern.permute.xlu1 %v136_v2  ;;  %v14_v3 = vstv %s234_s4  ;;  %v37_v4 = vld [vmem:[%s233_s2] sm:$0xff]  ;;  %v137_v9 = vmov 0.0   ;;  %v95_v11 = vlaneseq }
   0x2   :  { %130 = vmatpush.msk.msra.mxu0 %vm47_vm0, %v36_v0  ;;  %15 = vst [vmem:[#allocation2] sm:$0x1] %v14_v3  ;;  %v34_v5 = vld [vmem:[%s232_s0] sm:$0xff]  ;;  %40 = vperm.xlu0 %134, %v37_v4  }
   0x3   :  { %v33_v6 = vld [vmem:[%s235_s1] sm:$0xff]  ;;  %31 = vst.msk [vmem:[%s237_s7] sm:$0xff] %vm30_vm2, %v137_v9  ;;  %v96_v12 = vand.u32 127, %v95_v11 }
   0x4   :  { %65 = vmatpush.msra.mxu0 %v35_v1  ;;  %v72_v7 = vld [vmem:[%s236_s3] sm:$0xff]  ;;  %32 = vst.msk [vmem:[%s238_s8] sm:$0xff] %vm30_vm2, %v137_v9 }
   0x5   :  { %vm100_vm3 = vcmp.lt.s32.totalorder %v96_v12, 32 }
   0x6   :  { %66 = vmatpush.msra.mxu0 %v34_v5 }
   0x7   :  { %131 = vmatmul.msk.f32.vlgmr.msra.gmra.mxu0 %vm43_vm1, %v33_v6 }
   0x9   :  { %v85_v8 = vld [vmem:[#allocation2] sm:$0x1] }
   0xa   :  { %88 = vperm.xlu1 %135, %v85_v8   ;;  %75 = vperm.xlu0 %134, %v72_v7   ;;  %v102_v29 = vld [vmem:[%s237_s7] sm:$0xff] }
   0xb   :  { %v108_v31 = vld [vmem:[%s238_s8] sm:$0xff] }
  0x74   :  { %v41_v10 = vpop.permute.xlu0 %40 }
  0x7c   :  { %v76_v15 = vpop.permute.xlu0 %75  ;;  %v89_v22 = vpop.permute.xlu1 %88 }
  0x7d   :  { %v91_v25 = vperm.slane %v89_v22, 0 }
  0x84   :  { %v68_v13 = vpop.f32.mrf.mxu0 }
  0x85   :  { %v69_v14 = vadd.f32 %v68_v13, %v41_v10 }
  0x87   :  { %71 = vst [vmem:[%s239_s5] sm:$0xff] %v69_v14  ;;  %v78_v16 = vmul.f32 %v76_v15, %v69_v14  ;;  %v101_v17 = vsel %vm100_vm3, %v69_v14, 0.0 }
  0x88   :  { %103 = vadd.xlane.f32.xlu1 %v101_v17  ;;  %v109_v18 = vmul.f32 %v101_v17, %v101_v17 }
  0x89   :  { %v79_v19 = vrot.slane %v78_v16, 4 }
  0x8a   :  { %110 = vadd.xlane.f32.xlu2 %v109_v18 }
  0x8b   :  { %v80_v20 = vadd.f32 %v79_v19, %v78_v16 }
  0x8d   :  { %v81_v21 = vrot.slane %v80_v20, 2 }
  0x8f   :  { %v82_v23 = vadd.f32 %v81_v21, %v80_v20 }
  0x91   :  { %v83_v24 = vrot.slane %v82_v23, 1 }
  0x93   :  { %v84_v26 = vadd.f32 %v83_v24, %v82_v23 }
  0x95   :  { %v92_v27 = vadd.f32 %v91_v25, %v84_v26 }
  0x97   :  { %v93_v28 = vmax.f32 %v92_v27, 0.0 }
  0x99   :  { %94 = vst [vmem:[%s240_s6] sm:$0x1] %v93_v28 }
  0xfb   :  { %v104_v30 = vpop.xlane.xlu1 %103 }
  0xfc   :  { %v105_v32 = vadd.f32 %v104_v30, %v102_v29 }
  0xfd   :  { %v111_v33 = vpop.xlane.xlu2 %110 }
  0xfe   :  { %107 = vst.msk [vmem:[%s237_s7] sm:$0xff] %vm30_vm2, %v105_v32  ;;  %v112_v34 = vadd.f32 %v111_v33, %v108_v31 }
 0x100   :  { %113 = vst.msk [vmem:[%s238_s8] sm:$0xff] %vm30_vm2, %v112_v34 }

// kernel: res_egblk_1_forward.6
= control target key start
LH: loop header
LB: loop body
LE: loop exit
PB: predicated region body
PF: predicated region fallthrough
CT: control target
= control target key end

     0   :  { %vm32_vm0 = vcmask 64512   ;;  %v92_v2 = vmov 0   ;;  %vm21_vm1 = vcmask 7168   ;;  %v93_v4 = vmov 0.0   ;;  %s158_s0 = inlined_call_operand.vmem [shape: f32[8,128], index: 0, kind: input, shape index: {}]   ;;  %s159_s1 = inlined_call_operand.vmem [shape: f32[8,8], index: 1, kind: input, shape index: {}]   ;;  %s160_s2 = inlined_call_operand.vmem [shape: f32[8,1], index: 2, kind: input, shape index: {}]   ;;  %s161_s4 = inlined_call_operand.vmem [shape: f32[8,1], index: 4, kind: output, shape index: {1}]   ;;  %s162_s5 = inlined_call_operand.vmem [shape: f32[8,1], index: 5, kind: output, shape index: {2}]   ;;  %s163_s3 = inlined_call_operand.vmem [shape: f32[8,128], index: 3, kind: output, shape index: {0}]  }
   0x1   :  { %v25_v0 = vld [vmem:[%s158_s0] sm:$0xff]  ;;  %91 = vset.pattern.permute.xlu0 %v92_v2  ;;  %22 = vst.msk [vmem:[%s161_s4] sm:$0xff] %vm21_vm1, %v93_v4  ;;  %v57_v5 = vlaneseq }
   0x2   :  { %v24_v1 = vld [vmem:[%s159_s1] sm:$0xff]  ;;  %51 = vmatpush.msra.mxu0 %v25_v0  ;;  %23 = vst.msk [vmem:[%s162_s5] sm:$0xff] %vm21_vm1, %v93_v4 }
   0x3   :  { %v26_v3 = vld [vmem:[%s160_s2] sm:$0xff]  ;;  %88 = vmatmul.msk.f32.vlgmr.msra.gmra.mxu0 %vm32_vm0, %v24_v1  ;;  %v58_v6 = vand.u32 127, %v57_v5 }
   0x4   :  { %29 = vperm.xlu0 %91, %v26_v3  }
   0x5   :  { %vm62_vm2 = vcmp.lt.s32.totalorder %v58_v6, 16 }
   0x8   :  { %v64_v12 = vld [vmem:[%s161_s4] sm:$0xff] }
   0x9   :  { %v70_v14 = vld [vmem:[%s162_s5] sm:$0xff] }
  0x76   :  { %v30_v7 = vpop.permute.xlu0 %29 }
  0x80   :  { %v53_v8 = vpop.f32.mrf.mxu0 }
  0x81   :  { %v54_v9 = vadd.f32 %v53_v8, %v30_v7 }
  0x83   :  { %56 = vst [vmem:[%s163_s3] sm:$0xff] %v54_v9  ;;  %v63_v10 = vsel %vm62_vm2, %v54_v9, 0.0 }
  0x84   :  { %65 = vadd.xlane.f32.xlu0 %v63_v10  ;;  %v71_v11 = vmul.f32 %v63_v10, %v63_v10 }
  0x86   :  { %72 = vadd.xlane.f32.xlu1 %v71_v11 }
  0xf7   :  { %v66_v13 = vpop.xlane.xlu0 %65 }
  0xf8   :  { %v67_v15 = vadd.f32 %v66_v13, %v64_v12 }
  0xf9   :  { %v73_v16 = vpop.xlane.xlu1 %72 }
  0xfa   :  { %69 = vst.msk [vmem:[%s161_s4] sm:$0xff] %vm21_vm1, %v67_v15  ;;  %v74_v17 = vadd.f32 %v73_v16, %v70_v14 }
  0xfc   :  { %75 = vst.msk [vmem:[%s162_s5] sm:$0xff] %vm21_vm1, %v74_v17 }

// kernel: res_egblk_1_forward.7
= control target key start
LH: loop header
LB: loop body
LE: loop exit
PB: predicated region body
PF: predicated region fallthrough
CT: control target
= control target key end

     0   :  { %v42_v0 = vmov 0   ;;  %s83_s2 = inlined_call_operand.vmem [shape: f32[8,1], index: 2, kind: input, shape index: {}]   ;;  %s84_s3 = inlined_call_operand.vmem [shape: f32[8,1], index: 3, kind: input, shape index: {}]   ;;  %s85_s0 = inlined_call_operand.vmem [shape: f32[8,128], index: 0, kind: input, shape index: {}]   ;;  %s86_s1 = inlined_call_operand.vmem [shape: f32[8,128], index: 1, kind: input, shape index: {}]   ;;  %s87_s4 = inlined_call_operand.vmem [shape: f32[8,128], index: 4, kind: output, shape index: {}]  }
   0x1   :  { %41 = vset.pattern.permute.xlu0 %v42_v0  ;;  %v18_v1 = vld [vmem:[%s83_s2] sm:$0xff] }
   0x2   :  { %21 = vperm.xlu0 %41, %v18_v1   ;;  %v25_v2 = vld [vmem:[%s84_s3] sm:$0xff] }
   0x3   :  { %v17_v4 = vld [vmem:[%s85_s0] sm:$0xff] }
   0x4   :  { %v33_v8 = vld [vmem:[%s86_s1] sm:$0xff] }
   0xa   :  { %28 = vperm.xlu0 %41, %v25_v2  }
  0x74   :  { %v22_v3 = vpop.permute.xlu0 %21 }
  0x75   :  { %v24_v5 = vmul.f32 %v22_v3, %v17_v4 }
  0x7c   :  { %v29_v6 = vpop.permute.xlu0 %28 }
  0x7d   :  { %v31_v7 = vadd.f32 %v29_v6, %v24_v5 }
  0x7f   :  { %v32_v9 = vmax.f32 %v31_v7, 0.0 }
  0x81   :  { %v34_v10 = vadd.f32 %v33_v8, %v32_v9 }
  0x83   :  { %35 = vst [vmem:[%s87_s4] sm:$0xff] %v34_v10 }

</bundles_post_ra>
